<compile_context>
chip_gen: v6e
topology: v6e:2x2x1
jax: 0.10.0
libtpu: 0.0.40
codegen_flags: <defaults>
</compile_context>

<pallas_src>
import jax
import jax.numpy as jnp
from jax.experimental import pallas as pl
from jax.experimental.pallas import tpu as pltpu


def _round_up(x, m):
    return (x + m - 1) // m * m


# ---------------------------------------------------------------------------
# Fused kernel: whole CGANGenerator forward for one batch tile.
# ---------------------------------------------------------------------------
def _cgan_fused_kernel(z_ref, y_ref, w1z_ref, w1y_ref, b1_ref,
                       w2_ref, b2_ref, out_ref):
    # layer 1: h = relu(z @ W1z + ys @ W1y_fused + b1_fused)
    # bf16 MXU matmuls, f32 accumulate, f32 epilogue.
    h = jnp.dot(z_ref[...], w1z_ref[...], preferred_element_type=jnp.float32)
    h += jnp.dot(y_ref[...], w1y_ref[...], preferred_element_type=jnp.float32)
    h = jnp.maximum(h + b1_ref[...], 0.0)

    # layer 2: out = tanh(h @ W2 + b2)   (W2/out padded to a 128-multiple lane width)
    o = jnp.dot(h.astype(w2_ref.dtype), w2_ref[...],
                preferred_element_type=jnp.float32)
    out_ref[...] = jnp.tanh(o + b2_ref[...])


# ---------------------------------------------------------------------------
# pallas_call wrapper
# ---------------------------------------------------------------------------
def _cgan_fused_call(z, ys, fp, out_pad, *, tm):
    Bp = z.shape[0]
    grid = (Bp // tm,)
    return pl.pallas_call(
        _cgan_fused_kernel,
        out_shape=jax.ShapeDtypeStruct((Bp, out_pad), jnp.float32),
        grid_spec=pltpu.PrefetchScalarGridSpec(
            num_scalar_prefetch=0,
            grid=grid,
            in_specs=[
                # activations: tiled over the batch grid
                pl.BlockSpec((tm, z.shape[1]), lambda i: (i, 0)),
                pl.BlockSpec((tm, ys.shape[1]), lambda i: (i, 0)),
                # weights / biases: constant index_map -> stay resident in VMEM
                pl.BlockSpec(fp["w1z"].shape, lambda i: (0, 0)),
                pl.BlockSpec(fp["w1y"].shape, lambda i: (0, 0)),
                pl.BlockSpec(fp["b1"].shape, lambda i: (0, 0)),
                pl.BlockSpec(fp["w2"].shape, lambda i: (0, 0)),
                pl.BlockSpec(fp["b2"].shape, lambda i: (0, 0)),
            ],
            out_specs=pl.BlockSpec((tm, out_pad), lambda i: (i, 0)),
        ),
        compiler_params=pltpu.CompilerParams(
            dimension_semantics=("parallel",)),
    )(z, ys, fp["w1z"], fp["w1y"], fp["b1"], fp["w2"], fp["b2"])


def cgan_generator_forward(z_embs, ys, fused_params, img_shape, *, max_tm=256):
    """Equivalent of CGANGenerator.forward (y_encoder folded into G's first layer)."""
    B = z_embs.shape[0]
    C, H, W = img_shape
    out_dim = C * H * W
    out_pad = fused_params["w2"].shape[1]

    # Batch tile: multiple of 16 (bf16 sublane packing), capped at max_tm.
    tm = min(max_tm, _round_up(B, 16))
    Bp = _round_up(B, tm)

    z = z_embs.astype(jnp.bfloat16)
    y = ys.astype(jnp.bfloat16)
    if Bp != B:
        z = jnp.pad(z, ((0, Bp - B), (0, 0)))
        y = jnp.pad(y, ((0, Bp - B), (0, 0)))

    flat = _cgan_fused_call(z, y, fused_params, out_pad, tm=tm)
    # Drop batch / lane padding and reshape to NCHW (same as torch .view(B,C,H,W)).
    return flat[:B, :out_dim].reshape(B, C, H, W)


# ---------------------------------------------------------------------------
# Parameters: original (PyTorch-layout) params + host-side fusion/padding prep
# ---------------------------------------------------------------------------
def make_params(key, z_dim, y_dim, y_emb_dim, hidden, out_dim):
    """Mirrors init_weights: weight ~ N(0, 0.02), bias = 0."""
    k1, k2, k3 = jax.random.split(key, 3)
    return {
        "wy": 0.02 * jax.random.normal(k1, (y_dim, y_emb_dim), jnp.float32),
        "by": jnp.zeros((1, y_emb_dim), jnp.float32),
        "w1": 0.02 * jax.random.normal(k2, (z_dim + y_emb_dim, hidden), jnp.float32),
        "b1": jnp.zeros((1, hidden), jnp.float32),
        "w2": 0.02 * jax.random.normal(k3, (hidden, out_dim), jnp.float32),
        "b2": jnp.zeros((1, out_dim), jnp.float32),
    }


def prepare_fused_params(params, z_dim, lane=128):
    """One-time weight prep: fold y_encoder into layer 1, pad output lanes, cast to bf16."""
    wy, by = params["wy"], params["by"]
    w1, b1 = params["w1"], params["b1"]
    w2, b2 = params["w2"], params["b2"]

    w1z = w1[:z_dim]                    # (Z_DIM, HIDDEN)
    w1y_fused = wy @ w1[z_dim:]         # (Y_DIM, HIDDEN)  == y_encoder folded in
    b1_fused = b1 + by @ w1[z_dim:]     # (1, HIDDEN)

    out_dim = w2.shape[1]
    out_pad = _round_up(out_dim, lane)  # lane-dense output slab (unmasked stores)
    w2p = jnp.pad(w2, ((0, 0), (0, out_pad - out_dim)))
    b2p = jnp.pad(b2, ((0, 0), (0, out_pad - out_dim)))

    return {
        "w1z": w1z.astype(jnp.bfloat16),
        "w1y": w1y_fused.astype(jnp.bfloat16),
        "b1": b1_fused,                 # f32 (epilogue stays f32)
        "w2": w2p.astype(jnp.bfloat16),
        "b2": b2p,                      # f32 (epilogue stays f32)
    }


# ---------------------------------------------------------------------------
# Main
# ---------------------------------------------------------------------------
if __name__ == "__main__":
    B = 8              # batch
    Z_DIM = 32         # latent noise embedding dim
    Y_DIM = 10         # raw condition (one-hot-ish label) dim
    Y_EMB = 32         # y_encoder output dim
    HIDDEN = 128       # G hidden width
    C, H, W = 3, 8, 8  # generated image shape (NCHW)
    OUT_DIM = C * H * W

    key = jax.random.PRNGKey(0)
    kz, ky, kp = jax.random.split(key, 3)

    z_embs = jax.random.normal(kz, (B, Z_DIM), jnp.float32)
    ys = jax.random.normal(ky, (B, Y_DIM), jnp.float32)
    params = make_params(kp, Z_DIM, Y_DIM, Y_EMB, HIDDEN, OUT_DIM)
    fused = prepare_fused_params(params, Z_DIM)

    imgs = cgan_generator_forward(z_embs, ys, fused, (C, H, W))
    imgs = jax.block_until_ready(imgs)

    # Reference: exact module math in f32 (y_encoder -> concat -> MLP -> tanh).
    y_ref = ys @ params["wy"] + params["by"]
    zc = jnp.concatenate([z_embs, y_ref], axis=1)
    h = jnp.maximum(zc @ params["w1"] + params["b1"], 0.0)
    ref = jnp.tanh(h @ params["w2"] + params["b2"]).reshape(B, C, H, W)

    assert imgs.shape == (B, C, H, W)
    # Tolerance accounts for bf16 matmul operands (f32 accumulate) in the kernel.
    assert jnp.allclose(imgs, ref, atol=2e-2, rtol=2e-2)

    print("KERNEL_OK")
</pallas_src>

<mosaic_0001>
module attributes {stable_mosaic.version = 11 : i64} {
  func.func @_cgan_fused_kernel(%arg0: i32, %arg1: memref<16x32xbf16, #tpu.memory_space<vmem>>, %arg2: memref<16x10xbf16, #tpu.memory_space<vmem>>, %arg3: memref<32x128xbf16, #tpu.memory_space<vmem>>, %arg4: memref<10x128xbf16, #tpu.memory_space<vmem>>, %arg5: memref<1x128xf32, #tpu.memory_space<vmem>>, %arg6: memref<128x256xbf16, #tpu.memory_space<vmem>>, %arg7: memref<1x256xf32, #tpu.memory_space<vmem>>, %arg8: memref<16x256xf32, #tpu.memory_space<vmem>>) attributes {dimension_semantics = [#tpu.dimension_semantics<parallel>], iteration_bounds = array<i64: 1>, scalar_prefetch = 0 : i64, scratch_operands = 0 : i64, tpu.core_type = #tpu.core_type<tc>, window_params = [{transform_indices = @transform_0, window_bounds = array<i64: 16, 32>}, {transform_indices = @transform_1, window_bounds = array<i64: 16, 10>}, {pipeline_mode = #tpu.pipeline_mode<synchronous>, transform_indices = @transform_2, window_bounds = array<i64: 32, 128>}, {pipeline_mode = #tpu.pipeline_mode<synchronous>, transform_indices = @transform_3, window_bounds = array<i64: 10, 128>}, {pipeline_mode = #tpu.pipeline_mode<synchronous>, transform_indices = @transform_4, window_bounds = array<i64: 1, 128>}, {pipeline_mode = #tpu.pipeline_mode<synchronous>, transform_indices = @transform_5, window_bounds = array<i64: 128, 256>}, {pipeline_mode = #tpu.pipeline_mode<synchronous>, transform_indices = @transform_6, window_bounds = array<i64: 1, 256>}, {transform_indices = @transform_7, window_bounds = array<i64: 16, 256>}]} {
    %c0 = arith.constant 0 : index
    %c0_0 = arith.constant 0 : index
    %0 = vector.load %arg1[%c0, %c0_0] : memref<16x32xbf16, #tpu.memory_space<vmem>>, vector<16x32xbf16>
    %c0_1 = arith.constant 0 : index
    %c0_2 = arith.constant 0 : index
    %1 = vector.load %arg3[%c0_1, %c0_2] : memref<32x128xbf16, #tpu.memory_space<vmem>>, vector<32x128xbf16>
    %cst = arith.constant dense<0.000000e+00> : vector<16x128xf32>
    %2 = tpu.matmul %0, %1, %cst {dimension_numbers = #tpu.dot_dimension_numbers<[1], [0], [0], [1], [0, 0, 1, 1], [], []>} : vector<16x32xbf16>, vector<32x128xbf16>, vector<16x128xf32> -> vector<16x128xf32>
    %c0_3 = arith.constant 0 : index
    %c0_4 = arith.constant 0 : index
    %3 = vector.load %arg2[%c0_3, %c0_4] : memref<16x10xbf16, #tpu.memory_space<vmem>>, vector<16x10xbf16>
    %c0_5 = arith.constant 0 : index
    %c0_6 = arith.constant 0 : index
    %4 = vector.load %arg4[%c0_5, %c0_6] : memref<10x128xbf16, #tpu.memory_space<vmem>>, vector<10x128xbf16>
    %cst_7 = arith.constant dense<0.000000e+00> : vector<16x128xf32>
    %5 = tpu.matmul %3, %4, %cst_7 {dimension_numbers = #tpu.dot_dimension_numbers<[1], [0], [0], [1], [0, 0, 1, 1], [], []>} : vector<16x10xbf16>, vector<10x128xbf16>, vector<16x128xf32> -> vector<16x128xf32>
    %6 = arith.addf %2, %5 : vector<16x128xf32>
    %c0_8 = arith.constant 0 : index
    %c0_9 = arith.constant 0 : index
    %7 = vector.load %arg5[%c0_8, %c0_9] : memref<1x128xf32, #tpu.memory_space<vmem>>, vector<1x128xf32>
    %8 = vector.broadcast %7 : vector<1x128xf32> to vector<16x128xf32>
    %9 = arith.addf %6, %8 : vector<16x128xf32>
    %cst_10 = arith.constant 0.000000e+00 : f32
    %10 = vector.broadcast %cst_10 : f32 to vector<16x128xf32>
    %11 = arith.maximumf %9, %10 : vector<16x128xf32>
    %12 = arith.truncf %11 : vector<16x128xf32> to vector<16x128xbf16>
    %c0_11 = arith.constant 0 : index
    %c0_12 = arith.constant 0 : index
    %13 = vector.load %arg6[%c0_11, %c0_12] : memref<128x256xbf16, #tpu.memory_space<vmem>>, vector<128x256xbf16>
    %cst_13 = arith.constant dense<0.000000e+00> : vector<16x256xf32>
    %14 = tpu.matmul %12, %13, %cst_13 {dimension_numbers = #tpu.dot_dimension_numbers<[1], [0], [0], [1], [0, 0, 1, 1], [], []>} : vector<16x128xbf16>, vector<128x256xbf16>, vector<16x256xf32> -> vector<16x256xf32>
    %c0_14 = arith.constant 0 : index
    %c0_15 = arith.constant 0 : index
    %15 = vector.load %arg7[%c0_14, %c0_15] : memref<1x256xf32, #tpu.memory_space<vmem>>, vector<1x256xf32>
    %16 = vector.broadcast %15 : vector<1x256xf32> to vector<16x256xf32>
    %17 = arith.addf %14, %16 : vector<16x256xf32>
    %18 = math.tanh %17 : vector<16x256xf32>
    %c0_16 = arith.constant 0 : index
    %c0_17 = arith.constant 0 : index
    %19 = vector.load %arg8[%c0_16, %c0_17] : memref<16x256xf32, #tpu.memory_space<vmem>>, vector<16x256xf32>
    tpu.vector_store %arg8[%c0_16, %c0_17], %18 {strides = array<i32>} : memref<16x256xf32, #tpu.memory_space<vmem>>, vector<16x256xf32>,
    return
  }
  func.func @transform_0(%arg0: i32) -> (i32, i32) {
    %c0_i32 = arith.constant 0 : i32
    %c0_i32_0 = arith.constant 0 : i32
    return %arg0, %c0_i32 : i32, i32
  }
  func.func @transform_1(%arg0: i32) -> (i32, i32) {
    %c0_i32 = arith.constant 0 : i32
    %c0_i32_0 = arith.constant 0 : i32
    return %arg0, %c0_i32 : i32, i32
  }
  func.func @transform_2(%arg0: i32) -> (i32, i32) {
    %c0_i32 = arith.constant 0 : i32
    %c0_i32_0 = arith.constant 0 : i32
    %c0_i32_1 = arith.constant 0 : i32
    return %c0_i32, %c0_i32_0 : i32, i32
  }
  func.func @transform_3(%arg0: i32) -> (i32, i32) {
    %c0_i32 = arith.constant 0 : i32
    %c0_i32_0 = arith.constant 0 : i32
    %c0_i32_1 = arith.constant 0 : i32
    return %c0_i32, %c0_i32_0 : i32, i32
  }
  func.func @transform_4(%arg0: i32) -> (i32, i32) {
    %c0_i32 = arith.constant 0 : i32
    %c0_i32_0 = arith.constant 0 : i32
    %c0_i32_1 = arith.constant 0 : i32
    return %c0_i32, %c0_i32_0 : i32, i32
  }
  func.func @transform_5(%arg0: i32) -> (i32, i32) {
    %c0_i32 = arith.constant 0 : i32
    %c0_i32_0 = arith.constant 0 : i32
    %c0_i32_1 = arith.constant 0 : i32
    return %c0_i32, %c0_i32_0 : i32, i32
  }
  func.func @transform_6(%arg0: i32) -> (i32, i32) {
    %c0_i32 = arith.constant 0 : i32
    %c0_i32_0 = arith.constant 0 : i32
    %c0_i32_1 = arith.constant 0 : i32
    return %c0_i32, %c0_i32_0 : i32, i32
  }
  func.func @transform_7(%arg0: i32) -> (i32, i32) {
    %c0_i32 = arith.constant 0 : i32
    %c0_i32_0 = arith.constant 0 : i32
    return %arg0, %c0_i32 : i32, i32
  }
}

</mosaic_0001>

<bundles_post_ra>
// kernel: tpu_custom_call.1
= control target key start
LH: loop header
LB: loop body
LE: loop exit
PB: predicated region body
PF: predicated region fallthrough
CT: control target
= control target key end

     0   :  { %12 = vsyncpa [#allocation3], 0  ;;  %s731_s0 = inlined_call_operand.hbm [shape: bf16[16,32], index: 0, kind: input, shape index: {}]   ;;  %s732_s1 = inlined_call_operand.hbm [shape: bf16[16,10], index: 1, kind: input, shape index: {}]   ;;  %s733_s2 = inlined_call_operand.hbm [shape: bf16[32,128], index: 2, kind: input, shape index: {}]   ;;  %s734_s3 = inlined_call_operand.hbm [shape: bf16[10,128], index: 3, kind: input, shape index: {}]   ;;  %s735_s4 = inlined_call_operand.vmem [shape: f32[1,128], index: 4, kind: input, shape index: {}]   ;;  %s736_s5 = inlined_call_operand.hbm [shape: bf16[128,256], index: 5, kind: input, shape index: {}]   ;;  %s737_s6 = inlined_call_operand.vmem [shape: f32[1,256], index: 6, kind: input, shape index: {}]   ;;  %s738_s7 = inlined_call_operand.hbm [shape: f32[16,256], index: 7, kind: output, shape index: {}]  }
   0x1   :  { %13 = vsyncpa [#allocation6], 0 }
   0x2   :  { %14 = vsyncpa [#allocation9], 0 }
   0x3   :  { %15 = vsyncpa [#allocation4], 0  ;;  %s640_s24 = smov [#allocation5]   ;;  %s641_s26 = smov [#allocation8]  }
   0x4   :  { %s33_s25 = sshll.u32 %s640_s24, 4  ;;  %s57_s27 = sshll.u32 %s641_s26, 4  ;;  %s34_s25 = int_to_ptr.vmem [resolvable:$true] %s33_s25  ;;  %s58_s27 = int_to_ptr.vmem [resolvable:$true] %s57_s27 }
   0x5   :  { %s520_s28 = scalar_lea.vmem %s34_s25, 128  ;;  %p525_p1 = scmp.lt.s32.totalorder %s34_s25, %s34_s25 }
   0x6   :  { %p521_p0 = scmp.ne.s32.totalorder %s34_s25, %s520_s28  ;;  %p526_p2 = scmp.lt.s32.totalorder %s520_s28, %s520_s28 }
   0x8   :  { %p527_p3 = por %p526_p2, %p525_p1 }
   0xa   :  { %p528_p4 = pnand %p527_p3, %p521_p0 }
   0xc   :  { %531 = shalt.err (!%p528_p4)
}
   0xd   :  { %s642_s29 = smov 64   ;;  %s643_s30 = smov 4  }
   0xe   :  { %39 = dma.hbm_to_vmem [thread:$0]  %s732_s1, 128, %s34_s25, [#allocation6], %s642_s29, %s642_s29, %s643_s30  }
   0xf   :  { %s540_s10 = scalar_lea.vmem %s58_s27, 128  ;;  %p545_p6 = scmp.lt.s32.totalorder %s58_s27, %s58_s27 }
  0x10   :  { %p541_p5 = scmp.ne.s32.totalorder %s58_s27, %s540_s10  ;;  %p546_p7 = scmp.lt.s32.totalorder %s540_s10, %s540_s10 }
  0x12   :  { %p547_p8 = por %p546_p7, %p545_p6 }
  0x14   :  { %p548_p9 = pnand %p547_p8, %p541_p5 }
  0x16   :  { %551 = shalt.err (!%p548_p9)
}
  0x17   :  { %63 = dma.hbm_to_vmem [thread:$0]  %s734_s3, 128, %s58_s27, [#allocation9], %s642_s29, %s642_s29, %s643_s30  }
  0x18   :  { %s644_s13 = smov [#allocation2]   ;;  %s645_s15 = smov [#allocation7]  }
  0x19   :  { %s21_s14 = sshll.u32 %s644_s13, 4  ;;  %s45_s16 = sshll.u32 %s645_s15, 4  ;;  %s22_s14 = int_to_ptr.vmem [resolvable:$true] %s21_s14  ;;  %s46_s16 = int_to_ptr.vmem [resolvable:$true] %s45_s16 }
  0x1a   :  { %s560_s1 = scalar_lea.vmem %s22_s14, 128  ;;  %p565_p11 = scmp.lt.s32.totalorder %s22_s14, %s22_s14 }
  0x1b   :  { %p561_p10 = scmp.ne.s32.totalorder %s22_s14, %s560_s1  ;;  %p566_p12 = scmp.lt.s32.totalorder %s560_s1, %s560_s1 }
  0x1d   :  { %p567_p13 = por %p566_p12, %p565_p11 }
  0x1f   :  { %p568_p0 = pnand %p567_p13, %p561_p10 }
  0x21   :  { %571 = shalt.err (!%p568_p0)
}
  0x22   :  { %27 = dma.hbm_to_vmem [thread:$0]  %s731_s0, 128, %s22_s14, [#allocation3], %s642_s29, %s642_s29, %s643_s30  }
  0x23   :  { %s580_s3 = scalar_lea.vmem %s46_s16, 256  ;;  %p585_p2 = scmp.lt.s32.totalorder %s46_s16, %s46_s16 }
  0x24   :  { %p581_p1 = scmp.ne.s32.totalorder %s46_s16, %s580_s3  ;;  %p586_p3 = scmp.lt.s32.totalorder %s580_s3, %s580_s3 }
  0x26   :  { %p587_p4 = por %p586_p3, %p585_p2 }
  0x28   :  { %p588_p5 = pnand %p587_p4, %p581_p1 }
  0x2a   :  { %591 = shalt.err (!%p588_p5)
}
  0x2b   :  { %51 = dma.hbm_to_vmem [thread:$0]  %s733_s2, 256, %s46_s16, [#allocation6], %s642_s29, %s642_s29, %s643_s30  }
  0x2c   :  { %s646_s21 = smov [#allocation10]  }
  0x2d   :  { %s71_s22 = sshll.u32 %s646_s21, 4  ;;  %s72_s22 = int_to_ptr.vmem [resolvable:$true] %s71_s22 }
  0x2e   :  { %s600_s23 = scalar_lea.vmem %s72_s22, 2048  ;;  %p605_p7 = scmp.lt.s32.totalorder %s72_s22, %s72_s22 }
  0x2f   :  { %p601_p6 = scmp.ne.s32.totalorder %s72_s22, %s600_s23  ;;  %p606_p8 = scmp.lt.s32.totalorder %s600_s23, %s600_s23 }
  0x31   :  { %p607_p9 = por %p606_p8, %p605_p7 }
  0x33   :  { %p608_p10 = pnand %p607_p9, %p601_p6 }
  0x35   :  { %611 = shalt.err (!%p608_p10)
}
  0x36   :  { %s647_s0 = smov 128   ;;  %s648_s24 = smov 8  }
  0x37   :  { %77 = dma.hbm_to_vmem [thread:$0]  %s736_s5, 2048, %s72_s22, [#allocation9], %s647_s0, %s647_s0, %s648_s24  }
  0x38   :  { %632 = dma.done.wait [#allocation3], 128  }
  0x39   :  { %633 = vsyncadd [#allocation3], 4294967168 }
  0x3a   :  { %634 = dma.done.wait [#allocation6], 384  }
  0x3b   :  { %635 = vsyncadd [#allocation6], 4294966912 }
  0x3c   :  { %636 = dma.done.wait [#allocation9], 2176  }
  0x3d   :  { %637 = vsyncadd [#allocation9], 4294965120  ;;  %v649_v0 = vmov 0.0   ;;  %vm650_vm0 = vmmov 0   ;;  %vm120_vm1 = vcmask 1044480   ;;  %v476_v3 = vld [vmem:[#allocation5] sm:$0xff]   ;;  %v257_v40 = vlaneseq }
  0x3e   :  { %446 = vmatprep.subr.bf16.mxu1 %v649_v0  ;;  %448 = vmatprep.mubr.msk.bf16.mxu1 %vm650_vm0, %v649_v0  ;;  %v475_v1 = vld [vmem:[#allocation8] sm:$0x1f]   ;;  %vm116_vm2 = vcmask 80896   ;;  %v477_v4 = vld [vmem:[#allocation7 + $0x8] sm:$0xff]   ;;  %v478_v7 = vld [vmem:[#allocation7] sm:$0xff]   ;;  %vm182_vm3 = vcmask 261120  }
  0x3f   :  { %v122_v2 = vsel %vm120_vm1, %v475_v1, 0  ;;  %v480_v5 = vld [vmem:[#allocation10 + $0x74] ss:$8 sps:$4 sm:$0xff]   ;;  %v482_v6 = vld [vmem:[#allocation10 + $0x70] ss:$8 sps:$4 sm:$0xff]   ;;  %v651_v23 = vmov 0  }
  0x40   :  { %447 = vmatpush3.bf16.msra.mxu1 %v122_v2  ;;  %v483_v8 = vld [vmem:[#allocation10 + $0x64] ss:$8 sps:$4 sm:$0xff]   ;;  %v479_v9 = vld [vmem:[#allocation2] sm:$0xff]   ;;  %347 = vmatprep.subr.bf16.mxu0 %v480_v5  ;;  %v485_v10 = vld [vmem:[#allocation10 + $0x60] ss:$8 sps:$4 sm:$0xff]   ;;  %v258_v41 = vshrl.u32 %v257_v40, 7 }
  0x41   :  { %452 = vmatprep.subr.bf16.mxu1 %v649_v0  ;;  %v486_v11 = vld [vmem:[#allocation10 + $0x54] ss:$8 sps:$4 sm:$0xff]   ;;  %348 = vmatpush1.bf16.msra.mxu0 %v482_v6  ;;  %v488_v12 = vld [vmem:[#allocation10 + $0x50] ss:$8 sps:$4 sm:$0xff]   ;;  %v489_v13 = vld [vmem:[#allocation10 + $0x44] ss:$8 sps:$4 sm:$0xff]  }
  0x42   :  { %349 = vmatprep.subr.bf16.mxu0 %v483_v8  ;;  %v491_v14 = vld [vmem:[#allocation10 + $0x40] ss:$8 sps:$4 sm:$0xff]   ;;  %v492_v15 = vld [vmem:[#allocation10 + $0x34] ss:$8 sps:$4 sm:$0xff]   ;;  %v494_v16 = vld [vmem:[#allocation10 + $0x30] ss:$8 sps:$4 sm:$0xff]   ;;  %379 = vmatprep.mubr.bf16.mxu0 %v651_v23 }
  0x43   :  { %449 = vmatmul.mubr.msk.bf16.vlgmr.msra.gmra.mxu1 %vm116_vm2, %v476_v3  ;;  %v495_v17 = vld [vmem:[#allocation10 + $0x24] ss:$8 sps:$4 sm:$0xff]   ;;  %v497_v18 = vld [vmem:[#allocation10 + $0x20] ss:$8 sps:$4 sm:$0xff]   ;;  %v498_v19 = vld [vmem:[#allocation10 + $0x14] ss:$8 sps:$4 sm:$0xff]  }
  0x44   :  { %453 = vmatpush3.bf16.msra.mxu1 %v477_v4  ;;  %456 = vmatprep.mubr.msk.bf16.mxu1 %vm650_vm0, %v649_v0  ;;  %v500_v20 = vld [vmem:[#allocation10 + $0x10] ss:$8 sps:$4 sm:$0xff]   ;;  %v501_v21 = vld [vmem:[#allocation10 + $0x4] ss:$8 sps:$4 sm:$0xff]   ;;  %v503_v22 = vld [vmem:[#allocation10] ss:$8 sps:$4 sm:$0xff]  }
  0x45   :  { %454 = vmatprep.subr.bf16.mxu1 %v649_v0  ;;  %350 = vmatpush1.bf16.msra.mxu0 %v485_v10  ;;  %v424_v30 = vld [vmem:[%s735_s4] ss:$0 sm:$0xff]  ;;  %v259_v42 = vsub.s32 0, %v258_v41  ;;  %v263_v44 = vsub.s32 1, %v258_v41  ;;  %s652_s4 = smov [#allocation11]  }
  0x46   :  { %351 = vmatprep.subr.bf16.mxu0 %v486_v11  ;;  %v255_v43 = vld [vmem:[%s737_s6] sm:$0x3]  ;;  %s403_s29 = sshll.u32 %s652_s4, 4  ;;  %s404_s29 = int_to_ptr.vmem [resolvable:$true] %s403_s29 }
  0x47   :  { %v260_v45 = vrot.slane %v255_v43, %v259_v42  ;;  %v264_v46 = vrot.slane %v255_v43, %v263_v44  ;;  %s612_s6 = scalar_lea.vmem %s404_s29, 512  ;;  %p617_p12 = scmp.lt.s32.totalorder %s404_s29, %s404_s29 }
  0x48   :  { %455 = vmatpush3.bf16.msra.mxu1 %v478_v7  ;;  %p613_p11 = scmp.ne.s32.totalorder %s404_s29, %s612_s6  ;;  %p618_p13 = scmp.lt.s32.totalorder %s612_s6, %s612_s6 }
  0x49   :  { %352 = vmatpush1.bf16.msra.mxu0 %v488_v12 }
  0x4a   :  { %353 = vmatprep.subr.bf16.mxu0 %v489_v13  ;;  %p619_p0 = por %p618_p13, %p617_p12 }
  0x4b   :  { %457 = vmatmul.mubr.msk.bf16.vlgmr.msra.gmra.mxu1 %vm182_vm3, %v479_v9 }
  0x4c   :  { %p620_p1 = pnand %p619_p0, %p613_p11 }
  0x4d   :  { %354 = vmatpush1.bf16.msra.mxu0 %v491_v14 }
  0x4e   :  { %355 = vmatprep.subr.bf16.mxu0 %v492_v15 }
  0x51   :  { %356 = vmatpush1.bf16.msra.mxu0 %v494_v16 }
  0x52   :  { %357 = vmatprep.subr.bf16.mxu0 %v495_v17 }
  0x55   :  { %358 = vmatpush1.bf16.msra.mxu0 %v497_v18 }
  0x56   :  { %359 = vmatprep.subr.bf16.mxu0 %v498_v19 }
  0x59   :  { %360 = vmatpush1.bf16.msra.mxu0 %v500_v20 }
  0x5a   :  { %361 = vmatprep.subr.bf16.mxu0 %v501_v21 }
  0x5d   :  { %362 = vmatpush1.bf16.msra.mxu0 %v503_v22 }
 0x103   :  { %v158_v24 = vpop.f32.mrf.mxu1 }
 0x105   :  { %v450_v25 = vpop.f32.mrf.mxu1 }
 0x107   :  { %v161_v26 = vpop.f32.mrf.mxu1 }
 0x109   :  { %v451_v27 = vpop.f32.mrf.mxu1 }
 0x10b   :  { %v220_v28 = vpop.f32.mrf.mxu1 }
 0x10c   :  { %v221_v29 = vadd.f32 %v220_v28, %v158_v24 }
 0x10d   :  { %v458_v31 = vpop.f32.mrf.mxu1 }
 0x10e   :  { %v234_v33 = vadd.f32 %v424_v30, %v221_v29 }
 0x10f   :  { %v223_v32 = vpop.f32.mrf.mxu1 }
 0x110   :  { %v224_v34 = vadd.f32 %v223_v32, %v161_v26  ;;  %v236_v37 = vmax.f32 %v234_v33, 0.0 }
 0x111   :  { %v459_v35 = vpop.f32.mrf.mxu1 }
 0x112   :  { %v235_v36 = vadd.f32 %v424_v30, %v224_v34 }
 0x114   :  { %v237_v38 = vmax.f32 %v235_v36, 0.0 }
 0x116   :  { %v238_v39 = vpack.c.bf16 %v237_v38, %v236_v37 }
 0x118   :  { %380 = vmatmul.mubr.bf16.vlgmr.msra.gmra.mxu0 %v238_v39 }
 0x1d8   :  { %v381_v47 = vpop.f32.mrf.mxu0 }
 0x1d9   :  { %v382_v48 = vadd.f32 %v381_v47, %v260_v45 }
 0x1da   :  { %v383_v49 = vpop.f32.mrf.mxu0 }
 0x1db   :  { %504 = vtanh.f32 %v382_v48  ;;  %v384_v50 = vadd.f32 %v383_v49, %v264_v46 }
 0x1dc   :  { %v385_v51 = vpop.f32.mrf.mxu0 }
 0x1dd   :  { %506 = vtanh.f32 %v384_v50  ;;  %v386_v52 = vadd.f32 %v385_v51, %v260_v45 }
 0x1de   :  { %v387_v53 = vpop.f32.mrf.mxu0 }
 0x1df   :  { %508 = vtanh.f32 %v386_v52  ;;  %v388_v54 = vadd.f32 %v387_v53, %v264_v46 }
 0x1e1   :  { %510 = vtanh.f32 %v388_v54 }
 0x1e8   :  { %v505_v55 = vpop.eup %504 }
 0x1e9   :  { %394 = vst [vmem:[#allocation11] sm:$0xff] %v505_v55 }
 0x1ea   :  { %v507_v56 = vpop.eup %506 }
 0x1eb   :  { %395 = vst [vmem:[#allocation11 + $0x8] sm:$0xff] %v507_v56 }
 0x1ec   :  { %v509_v57 = vpop.eup %508 }
 0x1ed   :  { %396 = vst [vmem:[#allocation11 + $0x10] sm:$0xff] %v509_v57 }
 0x1ee   :  { %v511_v58 = vpop.eup %510 }
 0x1ef   :  { %397 = vst [vmem:[#allocation11 + $0x18] sm:$0xff] %v511_v58 }
 0x1f0   :  { %623 = shalt.err (!%p620_p1)
}
 0x1f1   :  { %s653_s30 = smov 256   ;;  %s654_s8 = smov 16  }
 0x1f2   :  { %409 = dma.vmem_to_hbm [thread:$0]  %s404_s29, 512, %s738_s7, [#allocation4], %s653_s30, %s653_s30, %s654_s8  }
 0x1f3   :  { %638 = dma.done.wait [#allocation4], 512  }
 0x1f4   :  { %639 = vsyncadd [#allocation4], 4294966784 }
 0x1f5   :  { %413 = vsyncpa [#allocation3], 1 }
 0x1f6   :  { %414 = vsyncpa [#allocation6], 1 }
 0x1f7   :  { %415 = vsyncpa [#allocation9], 1 }
 0x1f8   :  { %416 = vsyncpa [#allocation4], 1 }

</bundles_post_ra>
